<compile_context>
chip_gen: v7x
topology: tpu7x:2x2x1
jax: 0.10.0
libtpu: 0.0.40
codegen_flags: <defaults>
</compile_context>

<pallas_src>
import jax
import jax.numpy as jnp
from jax.experimental import pallas as pl
from jax.experimental.pallas import tpu as pltpu

T_STEPS = 30                      # fixed by nn.Linear(in_features=30, out_features=30)
_TARGET_BLOCK_BYTES = 2 << 20     # ~2 MiB streamed per input block (amortizes per-step cost)
_MAX_TILE_B = 1024                # keeps the in-kernel broadcast weight small
_VMEM_LIMIT = 48 * 1024 * 1024    # fits v7x's 64 MiB VMEM with headroom; trivial on v5e/v6e


def _attention_kernel(x_ref, w_ref, b_ref, o_ref):
    x = x_ref[...]                                    # (tile_b, 30, C), input dtype
    tile_b = x.shape[0]

    # bf16 matmul operands, f32 accumulation (keeps v5e's MXU off the critical path).
    xb = x.astype(jnp.bfloat16)
    wb = jnp.broadcast_to(w_ref[...].astype(jnp.bfloat16), (tile_b, T_STEPS, T_STEPS))

    # s[b, t, c] = sum_s W[t, s] * x[b, s, c] + bias[t]  -- one batched MXU dot,
    # result lands directly in the native (b, t, c) layout (no in-kernel transposes).
    s = jnp.einsum("bts,bsc->btc", wb, xb, preferred_element_type=jnp.float32)
    s = s + b_ref[...].astype(jnp.float32)            # (30, 1) broadcasts over (b, ., C)

    # Softmax over the time axis (axis 1) in f32 == softmax(dim=2) after the
    # PyTorch permute.  Exact reciprocal: VPU/EUP have huge slack here.
    s = s - jnp.max(s, axis=1, keepdims=True)
    e = jnp.exp(s)
    p = e / jnp.sum(e, axis=1, keepdims=True)

    # Reweight the original inputs; store in the native layout / input dtype.
    o_ref[...] = (p * x.astype(jnp.float32)).astype(o_ref.dtype)


def _choose_batch_tiling(B, C, itemsize):
    """Pick (tile_b, num_steps) for the batch-axis grid.

    Targets ~_TARGET_BLOCK_BYTES per streamed block and, whenever B > 1, an even
    number of steps >= 2 so v7x's two TensorCores both get work under
    dimension_semantics=("parallel",).  Blocks are balanced so padding (partial
    last block) is bounded to < one block of wasted work.
    """
    bytes_per_batch = T_STEPS * C * itemsize
    tile_b = max(1, min(B, _MAX_TILE_B, _TARGET_BLOCK_BYTES // max(1, bytes_per_batch)))
    steps = pl.cdiv(B, tile_b)
    if B > 1 and (steps < 2 or steps % 2):
        steps = min(B, max(2, steps + (steps % 2)))   # even, >= 2, <= B
        tile_b = pl.cdiv(B, steps)                    # balanced block size
        steps = pl.cdiv(B, tile_b)
    return tile_b, steps


def attention3d_block(inputs, weight, bias):
    """inputs: (B, 30, C); weight: (30, 30) [out, in]; bias: (30,). Returns (B, 30, C)."""
    B, T, C = inputs.shape
    assert T == T_STEPS, f"time axis must be {T_STEPS}, got {T}"
    itemsize = jnp.dtype(inputs.dtype).itemsize
    tile_b, steps = _choose_batch_tiling(B, C, itemsize)

    cost = pl.CostEstimate(
        flops=2 * B * T * T * C + 6 * B * T * C,       # linear + softmax/reweight
        transcendentals=B * T * C,                     # exp
        bytes_accessed=2 * B * T * C * itemsize + (T * T + T) * 4,
    )

    return pl.pallas_call(
        _attention_kernel,
        out_shape=jax.ShapeDtypeStruct((B, T, C), inputs.dtype),
        grid_spec=pltpu.PrefetchScalarGridSpec(
            num_scalar_prefetch=0,
            grid=(steps,),
            in_specs=[
                pl.BlockSpec((tile_b, T, C), lambda i: (i, 0, 0)),  # streamed, native layout
                pl.BlockSpec((T, T), lambda i: (0, 0)),             # weight (VMEM-resident)
                pl.BlockSpec((T, 1), lambda i: (0, 0)),             # bias   (VMEM-resident)
            ],
            out_specs=pl.BlockSpec((tile_b, T, C), lambda i: (i, 0, 0)),
        ),
        compiler_params=pltpu.CompilerParams(
            # "parallel" lets v7x shard the batch-tile axis across both TensorCores
            # (no-op on single-core v5e/v6e).  If xprof shows only one active core
            # on v7x, switch this axis to pltpu.CORE_PARALLEL.
            dimension_semantics=("parallel",),
            vmem_limit_bytes=_VMEM_LIMIT,
        ),
        cost_estimate=cost,
    )(inputs, weight, bias.reshape(T, 1))


def _reference(inputs, weight, bias):
    # Plain-JAX mirror of the PyTorch forward for a correctness check.
    x = jnp.transpose(inputs, (0, 2, 1))                 # (B, C, 30)
    y = jnp.einsum("bct,ot->bco", x, weight) + bias      # (B, C, 30)
    y = jax.nn.softmax(y, axis=2)
    probs = jnp.transpose(y, (0, 2, 1))                  # (B, 30, C)
    return probs * inputs


if __name__ == "__main__":
    key = jax.random.PRNGKey(0)
    attn = jax.jit(attention3d_block)

    # Small configs: lane-dense C (=128), C < 128, and a batch that does not
    # divide the tile (exercises the partial-last-block path).
    for (B, C) in [(4, 128), (2, 48), (5, 64)]:
        key, k_in, k_w, k_b = jax.random.split(key, 4)
        inputs = jax.random.normal(k_in, (B, T_STEPS, C), dtype=jnp.float32)

        # Deterministic nn.Linear(30, 30)-style init: U(-1/sqrt(30), 1/sqrt(30)).
        bound = 1.0 / (T_STEPS ** 0.5)
        weight = jax.random.uniform(k_w, (T_STEPS, T_STEPS), jnp.float32, -bound, bound)
        bias = jax.random.uniform(k_b, (T_STEPS,), jnp.float32, -bound, bound)

        out = jax.block_until_ready(attn(inputs, weight, bias))
        ref = _reference(inputs, weight, bias)
        assert out.shape == (B, T_STEPS, C)
        # 2e-3 tolerance covers the intentional bf16 matmul operands (f32 accumulate).
        assert jnp.allclose(out, ref, atol=2e-3, rtol=2e-3), f"mismatch vs reference (B={B}, C={C})"

    print("KERNEL_OK")
</pallas_src>

<mosaic_0001>
module attributes {stable_mosaic.version = 11 : i64} {
  func.func @_attention_kernel(%arg0: i32, %arg1: memref<2x30x128xf32, #tpu.memory_space<vmem>>, %arg2: memref<30x30xf32, #tpu.memory_space<vmem>>, %arg3: memref<30x1xf32, #tpu.memory_space<vmem>>, %arg4: memref<2x30x128xf32, #tpu.memory_space<vmem>>) attributes {dimension_semantics = [#tpu.dimension_semantics<parallel>], iteration_bounds = array<i64: 2>, scalar_prefetch = 0 : i64, scratch_operands = 0 : i64, tpu.core_type = #tpu.core_type<tc>, window_params = [{transform_indices = @transform_0, window_bounds = array<i64: 2, 30, 128>}, {pipeline_mode = #tpu.pipeline_mode<synchronous>, transform_indices = @transform_1, window_bounds = array<i64: 30, 30>}, {pipeline_mode = #tpu.pipeline_mode<synchronous>, transform_indices = @transform_2, window_bounds = array<i64: 30, 1>}, {transform_indices = @transform_3, window_bounds = array<i64: 2, 30, 128>}]} {
    %c0 = arith.constant 0 : index
    %c0_0 = arith.constant 0 : index
    %c0_1 = arith.constant 0 : index
    %0 = vector.load %arg1[%c0, %c0_0, %c0_1] : memref<2x30x128xf32, #tpu.memory_space<vmem>>, vector<2x30x128xf32>
    %1 = arith.truncf %0 : vector<2x30x128xf32> to vector<2x30x128xbf16>
    %c0_2 = arith.constant 0 : index
    %c0_3 = arith.constant 0 : index
    %2 = vector.load %arg2[%c0_2, %c0_3] : memref<30x30xf32, #tpu.memory_space<vmem>>, vector<30x30xf32>
    %3 = arith.truncf %2 : vector<30x30xf32> to vector<30x30xbf16>
    %4 = vector.shape_cast %3 : vector<30x30xbf16> to vector<1x30x30xbf16>
    %5 = vector.broadcast %4 : vector<1x30x30xbf16> to vector<2x30x30xbf16>
    "tpu.trace_start"() <{level = 10 : i32, message = "bts,bsc->btc"}> : () -> ()
    %cst = arith.constant dense<0.000000e+00> : vector<2x30x128xf32>
    %6 = tpu.matmul %5, %1, %cst {dimension_numbers = #tpu.dot_dimension_numbers<[2], [1], [1], [2], [0, 0, 0, 1, 1, 2], [0], [0]>} : vector<2x30x30xbf16>, vector<2x30x128xbf16>, vector<2x30x128xf32> -> vector<2x30x128xf32>
    "tpu.trace_stop"() : () -> ()
    %c0_4 = arith.constant 0 : index
    %c0_5 = arith.constant 0 : index
    %7 = vector.load %arg3[%c0_4, %c0_5] : memref<30x1xf32, #tpu.memory_space<vmem>>, vector<30x1xf32>
    %8 = vector.shape_cast %7 : vector<30x1xf32> to vector<1x30x1xf32>
    %9 = vector.broadcast %8 : vector<1x30x1xf32> to vector<2x30x128xf32>
    %10 = arith.addf %6, %9 : vector<2x30x128xf32>
    %cst_6 = arith.constant dense<0xFF800000> : vector<2x128xf32>
    %11 = vector.multi_reduction <maximumf>, %10, %cst_6 [1] : vector<2x30x128xf32> to vector<2x128xf32>
    %12 = vector.shape_cast %11 : vector<2x128xf32> to vector<2x1x128xf32>
    %13 = vector.broadcast %12 : vector<2x1x128xf32> to vector<2x30x128xf32>
    %14 = arith.subf %10, %13 : vector<2x30x128xf32>
    %15 = math.exp %14 : vector<2x30x128xf32>
    %cst_7 = arith.constant dense<0.000000e+00> : vector<2x128xf32>
    %16 = vector.multi_reduction <add>, %15, %cst_7 [1] : vector<2x30x128xf32> to vector<2x128xf32>
    %17 = vector.shape_cast %16 : vector<2x128xf32> to vector<2x1x128xf32>
    %18 = vector.broadcast %17 : vector<2x1x128xf32> to vector<2x30x128xf32>
    %19 = arith.divf %15, %18 : vector<2x30x128xf32>
    %20 = arith.mulf %19, %0 : vector<2x30x128xf32>
    %c0_8 = arith.constant 0 : index
    %c0_9 = arith.constant 0 : index
    %c0_10 = arith.constant 0 : index
    %21 = vector.load %arg4[%c0_8, %c0_9, %c0_10] : memref<2x30x128xf32, #tpu.memory_space<vmem>>, vector<2x30x128xf32>
    tpu.vector_store %arg4[%c0_8, %c0_9, %c0_10], %20 {strides = array<i32>} : memref<2x30x128xf32, #tpu.memory_space<vmem>>, vector<2x30x128xf32>,
    return
  }
  func.func @transform_0(%arg0: i32) -> (i32, i32, i32) {
    %c0_i32 = arith.constant 0 : i32
    %c0_i32_0 = arith.constant 0 : i32
    %c0_i32_1 = arith.constant 0 : i32
    return %arg0, %c0_i32, %c0_i32_0 : i32, i32, i32
  }
  func.func @transform_1(%arg0: i32) -> (i32, i32) {
    %c0_i32 = arith.constant 0 : i32
    %c0_i32_0 = arith.constant 0 : i32
    %c0_i32_1 = arith.constant 0 : i32
    return %c0_i32, %c0_i32_0 : i32, i32
  }
  func.func @transform_2(%arg0: i32) -> (i32, i32) {
    %c0_i32 = arith.constant 0 : i32
    %c0_i32_0 = arith.constant 0 : i32
    %c0_i32_1 = arith.constant 0 : i32
    return %c0_i32, %c0_i32_0 : i32, i32
  }
  func.func @transform_3(%arg0: i32) -> (i32, i32, i32) {
    %c0_i32 = arith.constant 0 : i32
    %c0_i32_0 = arith.constant 0 : i32
    %c0_i32_1 = arith.constant 0 : i32
    return %arg0, %c0_i32, %c0_i32_0 : i32, i32, i32
  }
}

</mosaic_0001>

<bundles_post_ra>
// kernel: attention3d_block.1
= control target key start
LH: loop header
LB: loop body
LE: loop exit
PB: predicated region body
PF: predicated region fallthrough
CT: control target
= control target key end

     0   :  { %s588_s12 = smov 0   ;;  %s676_s0 = inlined_call_operand.vmem [shape: f32[4,30,128], index: 0, kind: input, shape index: {}]   ;;  %s677_s1 = inlined_call_operand.vmem [shape: f32[30,30], index: 1, kind: input, shape index: {}]   ;;  %s678_s2 = inlined_call_operand.vmem [shape: f32[30,1], index: 2, kind: input, shape index: {}]   ;;  %s679_s3 = inlined_call_operand.vmem [shape: f32[4,30,128], index: 3, kind: output, shape index: {}]  }
   0x1 LB: > { %s483_s13 = sadd.s32 4294967295, %s565_s12   ;;  %p487_p0 = scmp.ge.s32.totalorder %s565_s12, 1  ;;  %s565_s12 = sphi %s588_s12, %s13_s12  }
   0x2   : > { %p139_p1 = scmp.lt.s32.totalorder %s565_s12, 3 }
   0x4   : > { %p140_p2 = pnand %p487_p0, %p139_p1 }
   0x5   : > { %s488_s14 = sshll.u32 (!%p140_p2), %s483_s13, 1  ;;  %v192_v0 = vld [vmem:[%s677_s1] sm:$0xff] (!%p140_p2)  ;;  %v193_v1 = vld [vmem:[%s677_s1 + $0x8] sm:$0xff] (!%p140_p2)  ;;  %vm222_vm0 = vcmask (!%p140_p2), 244736   ;;  %v201_v3 = vld [vmem:[%s678_s2 + $0x18] sm:$0x3f] (!%p140_p2) }
   0x6   : > { %143 = sbr.rel (%p140_p2) target bundleno = 315 (0x13b), region = 32  ;;  %p166_p3 = scmp.lt.s32.totalorder (!%p140_p2), %s488_s14, 3  ;;  %v196_v2 = vpack.c.bf16 (!%p140_p2), %v193_v1, %v192_v0  ;;  %v567_v4 = vmov (!%p140_p2), 0   ;;  %v199_v5 = vld [vmem:[%s678_s2 + $0x8] sm:$0xff] (!%p140_p2)  ;;  %v200_v6 = vld [vmem:[%s678_s2 + $0x10] sm:$0xff] (!%p140_p2)  ;;  %v198_v7 = vld [vmem:[%s678_s2] sm:$0xff] (!%p140_p2) }
   0x7   : > { %538 = vset.pattern.permute.xlu1 (!%p140_p2), %v567_v4  ;;  %537 = vset.pattern.permute.xlu0 (!%p140_p2), %v567_v4  ;;  %vm229_vm1 = vcmask (!%p140_p2), 1046528   ;;  %v194_v20 = vld [vmem:[%s677_s1 + $0x10] sm:$0xff] (!%p140_p2)  ;;  %v195_v21 = vld [vmem:[%s677_s1 + $0x18] sm:$0x3f] (!%p140_p2)  ;;  %vm335_vm2 = vcmask (!%p140_p2), 1045504  }
   0x8   : > { %514 = vmatprep.mubr.msk.bf16.mxu0 (!%p140_p2), %vm222_vm0, %v196_v2  ;;  %522 = vmatprep.mubr.msk.bf16.mxu1 (!%p140_p2), %vm222_vm0, %v196_v2  ;;  %v197_v24 = vpack.c.bf16 (!%p140_p2), %v195_v21, %v194_v20 }
   0x9   : > { %219 = vperm.xlu0 (!%p140_p2), %537, %v201_v3   ;;  %209 = vperm.xlu1 (!%p140_p2), %538, %v199_v5  }
   0xd   : > { %s681_s14 = smov (!%p166_p3, %s488_s14), 3  ;;  %214 = vperm.xlu1 %538, %v200_v6   ;;  %204 = vperm.xlu0 %537, %v198_v7  }
   0xe   : > { %s500_s23 = sshll.u32 %s681_s14, 5 }
   0xf   : > { %s170_s30 = scalar_lea.vmem %s676_s0, %s500_s23  ;;  %s177_s10 = scalar_lea.vmem %s679_s3, %s500_s23 }
  0x10   : > { %v624_v8 = vld [vmem:[%s170_s30] sm:$0xff]  ;;  %v626_v9 = vld [vmem:[%s170_s30 + $0x8] sm:$0xff]  ;;  %v634_v13 = vld [vmem:[%s170_s30 + $0x10] sm:$0xff] }
  0x11   : > { %v628_v10 = vld [vmem:[%s170_s30 + $0x20] sm:$0xff]  ;;  %v188_v11 = vpack.c.bf16 %v626_v9, %v624_v8  ;;  %v632_v12 = vld [vmem:[%s170_s30 + $0x28] sm:$0xff]  ;;  %v636_v14 = vld [vmem:[%s170_s30 + $0x18] sm:$0x3f] }
  0x12   : > { %v190_v15 = vpack.c.bf16 %v632_v12, %v628_v10  ;;  %v189_v16 = vpack.c.bf16 %v636_v14, %v634_v13  ;;  %v642_v17 = vld [vmem:[%s170_s30 + $0x30] sm:$0xff]  ;;  %v644_v18 = vld [vmem:[%s170_s30 + $0x38] sm:$0x3f] }
  0x13   : > { %510 = vmatprep.subr.bf16.mxu0 %v188_v11  ;;  %v191_v19 = vpack.c.bf16 %v644_v18, %v642_v17 }
  0x14   : > { %518 = vmatprep.subr.bf16.mxu1 %v190_v15  ;;  %511 = vmatpush3.bf16.msra.mxu0 %v188_v11  ;;  %v231_v22 = vsel %vm229_vm1, %v189_v16, 0 }
  0x15   : > { %519 = vmatpush3.bf16.msra.mxu1 %v190_v15  ;;  %526 = vmatprep.subr.msk.bf16.mxu0 %vm229_vm1, %v189_v16  ;;  %v283_v23 = vsel %vm229_vm1, %v191_v19, 0 }
  0x16   : > { %527 = vmatprep.subr.msk.bf16.mxu1 %vm229_vm1, %v191_v19 }
  0x18   : > { %513 = vmatpush3.bf16.msra.mxu0 %v231_v22 }
  0x19   : > { %521 = vmatpush3.bf16.msra.mxu1 %v283_v23 }
  0x1b   : > { %515 = vmatmul.mubr.msk.bf16.vlgmr.msra.gmra.mrb[0].mxu0 %vm222_vm0, %v197_v24 }
  0x1c   : > { %523 = vmatmul.mubr.msk.bf16.vlgmr.msra.gmra.mrb[0].mxu1 %vm222_vm0, %v197_v24 }
  0x88   : > { %v210_v25 = vpop.permute.xlu1 %209  ;;  %v220_v26 = vpop.permute.xlu0 %219 }
  0x8c   : > { %v215_v27 = vpop.permute.xlu1 %214  ;;  %v205_v28 = vpop.permute.xlu0 %204 }
  0xee   : > { %v516_v29 = vpop.f32.mrb[0].mxu0 }
  0xef   : > { %v276_v30 = vadd.f32 %v516_v29, %v215_v27  ;;  %v524_v31 = vpop.f32.mrb[0].mxu1  ;;  %v267_v32 = vpop.f32.mrb[1].mxu0 }
  0xf0   : > { %v328_v33 = vadd.f32 %v524_v31, %v215_v27  ;;  %v268_v34 = vadd.f32 %v267_v32, %v205_v28  ;;  %v319_v35 = vpop.f32.mrb[1].mxu1  ;;  %v517_v36 = vpop.f32.mrb[2].mxu0 }
  0xf1   : > { %v320_v37 = vadd.f32 %v319_v35, %v205_v28  ;;  %v279_v38 = vadd.f32 %v517_v36, %v220_v26  ;;  %v525_v39 = vpop.f32.mrb[2].mxu1  ;;  %v270_v40 = vpop.f32.mrb[3].mxu0 }
  0xf2   : > { %v334_v41 = vmax.f32 %v268_v34, %v276_v30  ;;  %v331_v42 = vadd.f32 %v525_v39, %v220_v26  ;;  %v271_v43 = vadd.f32 %v270_v40, %v210_v25  ;;  %v322_v44 = vpop.f32.mrb[3].mxu1 }
  0xf3   : > { %v345_v45 = vmax.f32 %v320_v37, %v328_v33  ;;  %v336_v46 = vsel %vm335_vm2, %v279_v38, -inf  ;;  %v323_v47 = vadd.f32 %v322_v44, %v210_v25 }
  0xf4   : > { %v346_v48 = vsel %vm335_vm2, %v331_v42, -inf  ;;  %v337_v49 = vmax.f32 %v271_v43, %v336_v46 }
  0xf5   : > { %v347_v50 = vmax.f32 %v323_v47, %v346_v48 }
  0xf6   : > { %v338_v51 = vmax.f32 %v334_v41, %v337_v49 }
  0xf7   : > { %v348_v52 = vmax.f32 %v345_v45, %v347_v50 }
  0xf8   : > { %v339_v53 = vrot.slane %v338_v51, 4 }
  0xf9   : > { %v349_v54 = vrot.slane %v348_v52, 4 }
  0xfa   : > { %v340_v55 = vmax.f32 %v338_v51, %v339_v53 }
  0xfb   : > { %v350_v56 = vmax.f32 %v348_v52, %v349_v54 }
  0xfc   : > { %v341_v57 = vrot.slane %v340_v55, 2 }
  0xfd   : > { %v351_v58 = vrot.slane %v350_v56, 2 }
  0xfe   : > { %v342_v59 = vmax.f32 %v340_v55, %v341_v57 }
  0xff   : > { %v352_v60 = vmax.f32 %v350_v56, %v351_v58 }
 0x100   : > { %v343_v61 = vrot.slane %v342_v59, 1 }
 0x101   : > { %v353_v62 = vrot.slane %v352_v60, 1 }
 0x102   : > { %v344_v63 = vmax.f32 %v342_v59, %v343_v61 }
 0x103   : > { %v354_v0 = vmax.f32 %v352_v60, %v353_v62 }
 0x104   : > { %v355_v1 = vsub.f32 %v268_v34, %v344_v63  ;;  %v356_v2 = vsub.f32 %v271_v43, %v344_v63  ;;  %v357_v3 = vsub.f32 %v276_v30, %v344_v63  ;;  %v358_v4 = vsub.f32 %v279_v38, %v344_v63 }
 0x105   : > { %v359_v5 = vsub.f32 %v320_v37, %v354_v0  ;;  %v360_v6 = vsub.f32 %v323_v47, %v354_v0  ;;  %v361_v7 = vsub.f32 %v328_v33, %v354_v0  ;;  %v362_v11 = vsub.f32 %v331_v42, %v354_v0 }
 0x106   : > { %v363_v15 = vmul.f32 1.442695, %v355_v1  ;;  %v365_v16 = vmul.f32 1.442695, %v356_v2  ;;  %v367_v19 = vmul.f32 1.442695, %v357_v3 }
 0x107   : > { %v369_v20 = vmul.f32 1.442695, %v358_v4  ;;  %v371_v21 = vmul.f32 1.442695, %v359_v5  ;;  %v373_v22 = vmul.f32 1.442695, %v360_v6 }
 0x108   : > { %539 = vpow2.f32 %v363_v15  ;;  %v375_v23 = vmul.f32 1.442695, %v361_v7  ;;  %v377_v24 = vmul.f32 1.442695, %v362_v11 }
 0x109   : > { %541 = vpow2.f32 %v365_v16 }
 0x10a   : > { %543 = vpow2.f32 %v367_v19 }
 0x10b   : > { %545 = vpow2.f32 %v369_v20 }
 0x10c   : > { %547 = vpow2.f32 %v371_v21 }
 0x10d   : > { %549 = vpow2.f32 %v373_v22 }
 0x10e   : > { %551 = vpow2.f32 %v375_v23 }
 0x10f   : > { %553 = vpow2.f32 %v377_v24 }
 0x112   : > { %v540_v25 = vpop.eup %539 }
 0x113   : > { %v542_v26 = vpop.eup %541 }
 0x114   : > { %v544_v27 = vpop.eup %543  ;;  %v379_v28 = vadd.f32 %v542_v26, %v540_v25 }
 0x115   : > { %v546_v29 = vpop.eup %545 }
 0x116   : > { %v548_v30 = vpop.eup %547  ;;  %v380_v31 = vadd.f32 %v544_v27, %v379_v28  ;;  %v381_v33 = vsel %vm335_vm2, %v546_v29, 0.0 }
 0x117   : > { %v550_v32 = vpop.eup %549 }
 0x118   : > { %v552_v34 = vpop.eup %551  ;;  %v382_v35 = vadd.f32 %v381_v33, %v380_v31  ;;  %v389_v36 = vadd.f32 %v550_v32, %v548_v30 }
 0x119   : > { %v554_v37 = vpop.eup %553 }
 0x11a   : > { %v383_v38 = vrot.slane %v382_v35, 4  ;;  %v390_v39 = vadd.f32 %v552_v34, %v389_v36  ;;  %v391_v40 = vsel %vm335_vm2, %v554_v37, 0.0 }
 0x11c   : > { %v384_v41 = vadd.f32 %v383_v38, %v382_v35  ;;  %v392_v42 = vadd.f32 %v391_v40, %v390_v39 }
 0x11e   : > { %v385_v43 = vrot.slane %v384_v41, 2  ;;  %v393_v44 = vrot.slane %v392_v42, 4 }
 0x120   : > { %v386_v45 = vadd.f32 %v385_v43, %v384_v41  ;;  %v394_v46 = vadd.f32 %v393_v44, %v392_v42 }
 0x122   : > { %v387_v47 = vrot.slane %v386_v45, 1  ;;  %v395_v48 = vrot.slane %v394_v46, 2 }
 0x124   : > { %v388_v49 = vadd.f32 %v387_v47, %v386_v45  ;;  %v396_v50 = vadd.f32 %v395_v48, %v394_v46 }
 0x126   : > { %555 = vrcp.f32 %v388_v49  ;;  %v397_v51 = vrot.slane %v396_v50, 1 }
 0x128   : > { %v398_v52 = vadd.f32 %v397_v51, %v396_v50 }
 0x12a   : > { %557 = vrcp.f32 %v398_v52 }
 0x130   : > { %v556_v53 = vpop.eup %555 }
 0x131   : > { %v400_v54 = vmul.f32 %v556_v53, %v540_v25  ;;  %v401_v55 = vmul.f32 %v556_v53, %v542_v26  ;;  %v402_v56 = vmul.f32 %v556_v53, %v544_v27  ;;  %v403_v57 = vmul.f32 %v556_v53, %v546_v29 }
 0x133   : > { %v409_v58 = vmul.f32 %v400_v54, %v624_v8  ;;  %v410_v59 = vmul.f32 %v401_v55, %v626_v9  ;;  %v411_v60 = vmul.f32 %v402_v56, %v634_v13  ;;  %v412_v61 = vmul.f32 %v403_v57, %v636_v14 }
 0x134   : > { %v558_v62 = vpop.eup %557 }
 0x135   : > { %417 = vst [vmem:[%s177_s10] sm:$0xff] %v409_v58  ;;  %418 = vst [vmem:[%s177_s10 + $0x8] sm:$0xff] %v410_v59  ;;  %v405_v63 = vmul.f32 %v558_v62, %v548_v30  ;;  %v406_v0 = vmul.f32 %v558_v62, %v550_v32  ;;  %v407_v1 = vmul.f32 %v558_v62, %v552_v34 }
 0x136   : > { %419 = vst [vmem:[%s177_s10 + $0x10] sm:$0xff] %v411_v60  ;;  %420 = vst [vmem:[%s177_s10 + $0x18] sm:$0x3f] %v412_v61  ;;  %v408_v2 = vmul.f32 %v558_v62, %v554_v37 }
 0x137   : > { %v413_v3 = vmul.f32 %v405_v63, %v628_v10  ;;  %v414_v4 = vmul.f32 %v406_v0, %v632_v12  ;;  %v415_v8 = vmul.f32 %v407_v1, %v642_v17 }
 0x138   : > { %v416_v9 = vmul.f32 %v408_v2, %v644_v18 }
 0x139   : > { %421 = vst [vmem:[%s177_s10 + $0x20] sm:$0xff] %v413_v3  ;;  %422 = vst [vmem:[%s177_s10 + $0x28] sm:$0xff] %v414_v4 }
 0x13a   : > { %423 = vst [vmem:[%s177_s10 + $0x30] sm:$0xff] %v415_v8  ;;  %424 = vst [vmem:[%s177_s10 + $0x38] sm:$0x3f] %v416_v9 }
 0x13b PF: > { %s13_s12 = sadd.s32 1, %s565_s12  }
 0x13c   : > { %p10_p4 = scmp.ge.s32.totalorder %s13_s12, 4  }
 0x13e   :  { %12 = sbr.rel (!%p10_p4) target bundleno = 1 (0x1), region = 62 }

</bundles_post_ra>
